<compile_context>
chip_gen: v7x
topology: tpu7x:2x2x1
jax: 0.10.0
libtpu: 0.0.40
codegen_flags: <defaults>
</compile_context>

<pallas_src>
import functools

import jax
import jax.numpy as jnp
from jax.experimental import pallas as pl
from jax.experimental.pallas import tpu as pltpu

EPS = 1e-5                       # PyTorch LayerNorm default
LANE = 128                       # TPU lane width
SUBLANE = 8
TILE_N_MAX = 1024                # upper bound on rows per grid step
VMEM_TILE_BUDGET = 32 * 1024 * 1024   # budget used to size tile_n
VMEM_LIMIT_BYTES = 56 * 1024 * 1024   # scoped-VMEM limit (fits v7x's 64 MiB)


def _round_up(n, m):
    return ((n + m - 1) // m) * m


def _pad_2d(a, rows, cols):
    r, c = a.shape
    return jnp.pad(a, ((0, rows - r), (0, cols - c)))


def _pick_tile_n(in_pad, hid_pad, out_pad, act_bytes):
    """Largest row tile (multiple of 8, <= TILE_N_MAX) fitting the VMEM budget."""
    # Resident, single-buffered weights + (tiny) f32 LN params / biases.
    fixed = (in_pad * hid_pad + hid_pad * out_pad) * act_bytes \
            + (2 * in_pad + hid_pad + 3 * out_pad) * 4
    # Per-row bytes: double-buffered x (act dtype), double-buffered f32 output,
    # plus a rough allowance for in-kernel f32 intermediates (x, h, y).
    per_row = 2 * in_pad * act_bytes + 2 * out_pad * 4 \
              + (in_pad + hid_pad + out_pad) * 4
    avail = VMEM_TILE_BUDGET - fixed
    tile = avail // per_row if avail > 0 else SUBLANE
    return int(max(SUBLANE, min(TILE_N_MAX, (tile // SUBLANE) * SUBLANE)))


def _layernorm_padded(x, gamma, beta, d_true):
    """LayerNorm over the last axis.  Lanes >= d_true of `x`, `gamma`, `beta`
    are exactly zero, so plain sums over the padded width are exact and padded
    output lanes stay zero (gamma=beta=0 there)."""
    inv_d = 1.0 / d_true
    mean = jnp.sum(x, axis=-1, keepdims=True) * inv_d
    mean_sq = jnp.sum(x * x, axis=-1, keepdims=True) * inv_d
    var = mean_sq - mean * mean
    inv = jax.lax.rsqrt(var + EPS)          # EUP rsqrt — off the VALU slot
    return (x - mean) * inv * gamma + beta


def _mlp_encoder_kernel(x_ref,
                        g_in_ref, b_in_ref,
                        w1t_ref, b1_ref,
                        w2t_ref, b2_ref,
                        g_out_ref, b_out_ref,
                        o_ref, *, in_true, out_true, mxu_dtype):
    # Upcast streamed activations to f32 for LayerNorm math.
    x = x_ref[...].astype(jnp.float32)                    # (TILE_N, IN_PAD)

    # input LayerNorm (+ eval-mode dropout = identity)
    h = _layernorm_padded(x, g_in_ref[...], b_in_ref[...], in_true)

    # hidden Linear + ReLU  (weights pre-transposed: [in_pad, hid_pad])
    h = jnp.dot(h.astype(mxu_dtype), w1t_ref[...],
                preferred_element_type=jnp.float32)
    h = jnp.maximum(h + b1_ref[...], 0.0)

    # output Linear  ([hid_pad, out_pad]); padded out lanes come out exactly 0
    y = jnp.dot(h.astype(mxu_dtype), w2t_ref[...],
                preferred_element_type=jnp.float32)
    y = y + b2_ref[...]

    # output LayerNorm (+ eval-mode dropout = identity)
    y = _layernorm_padded(y, g_out_ref[...], b_out_ref[...], out_true)

    o_ref[...] = y.astype(o_ref.dtype)


def mlp_encoder(x, params, tile_n=None, act_dtype=jnp.bfloat16):
    """x: [N, in_dim] float32.  params: see init_params (PyTorch-layout weights).

    act_dtype: dtype used to stream x and the weight matrices through HBM/MXU
    (bf16 by default; pass jnp.float32 for a full-precision path).  LayerNorm
    math, biases and accumulation are always f32.
    """
    N, in_dim = x.shape
    hidden_dim = params["w1"].shape[0]
    out_dim = params["w2"].shape[0]

    in_pad = _round_up(in_dim, LANE)
    hid_pad = _round_up(hidden_dim, LANE)
    out_pad = _round_up(out_dim, LANE)

    act_bytes = jnp.dtype(act_dtype).itemsize
    if tile_n is None:
        tile_n = _pick_tile_n(in_pad, hid_pad, out_pad, act_bytes)
        # Keep >= 2 grid steps whenever possible so both v7x TensorCores get
        # work ("parallel" axis); harmless single-TC overhead on v5e/v6e.
        tile_n = min(tile_n, _round_up(pl.cdiv(N, 2), SUBLANE))
    tile_n = max(SUBLANE, _round_up(tile_n, SUBLANE))
    tile_n = min(tile_n, _round_up(N, SUBLANE))
    grid = (pl.cdiv(N, tile_n),)

    # Host-side prep: lane-pad feature dims only (no row padding), pre-transpose
    # weights to [in, out] for the MXU, stream x / weights in act_dtype.
    x_p = _pad_2d(x.astype(jnp.float32), N, in_pad).astype(act_dtype)
    g_in = _pad_2d(params["ln_in_gamma"][None, :], 1, in_pad)
    b_in = _pad_2d(params["ln_in_beta"][None, :], 1, in_pad)
    w1t = _pad_2d(params["w1"].T, in_pad, hid_pad).astype(act_dtype)
    b1 = _pad_2d(params["b1"][None, :], 1, hid_pad)
    w2t = _pad_2d(params["w2"].T, hid_pad, out_pad).astype(act_dtype)
    b2 = _pad_2d(params["b2"][None, :], 1, out_pad)
    g_out = _pad_2d(params["ln_out_gamma"][None, :], 1, out_pad)
    b_out = _pad_2d(params["ln_out_beta"][None, :], 1, out_pad)

    def resident_spec(shape):
        # Constant block index -> never re-DMA'd across grid steps; single
        # buffer (Buffered(1)) so it occupies 1x (not 2x) VMEM.
        return pl.BlockSpec(shape, lambda i: (0, 0),
                            pipeline_mode=pl.Buffered(1))

    in_specs = [
        pl.BlockSpec((tile_n, in_pad), lambda i: (i, 0)),            # x (row-tiled)
        resident_spec((1, in_pad)), resident_spec((1, in_pad)),      # LN_in gamma/beta
        resident_spec((in_pad, hid_pad)), resident_spec((1, hid_pad)),   # W1^T, b1
        resident_spec((hid_pad, out_pad)), resident_spec((1, out_pad)),  # W2^T, b2
        resident_spec((1, out_pad)), resident_spec((1, out_pad)),    # LN_out gamma/beta
    ]
    out_spec = pl.BlockSpec((tile_n, out_pad), lambda i: (i, 0))

    kernel = functools.partial(_mlp_encoder_kernel,
                               in_true=in_dim, out_true=out_dim,
                               mxu_dtype=jnp.dtype(act_dtype))

    out = pl.pallas_call(
        kernel,
        out_shape=jax.ShapeDtypeStruct((N, out_pad), jnp.float32),
        grid_spec=pltpu.PrefetchScalarGridSpec(
            num_scalar_prefetch=0,
            grid=grid,
            in_specs=in_specs,
            out_specs=out_spec,
        ),
        compiler_params=pltpu.CompilerParams(
            dimension_semantics=("parallel",),      # rows shard across TCs on v7x
            vmem_limit_bytes=VMEM_LIMIT_BYTES,
        ),
    )(x_p, g_in, b_in, w1t, b1, w2t, b2, g_out, b_out)

    # Column trim only (no-op when out_dim is already lane-aligned).
    return out if out_pad == out_dim else out[:, :out_dim]


def init_params(key, in_dim, hidden_dim, out_dim):
    ks = jax.random.split(key, 4)
    # deterministic, small-magnitude synthetic init (not a checkpoint)
    w1 = jax.random.normal(ks[0], (hidden_dim, in_dim), jnp.float32) * 0.05
    b1 = jax.random.normal(ks[1], (hidden_dim,), jnp.float32) * 0.01
    w2 = jax.random.normal(ks[2], (out_dim, hidden_dim), jnp.float32) * 0.05
    b2 = jax.random.normal(ks[3], (out_dim,), jnp.float32) * 0.01
    return {
        "ln_in_gamma": jnp.ones((in_dim,), jnp.float32),
        "ln_in_beta": jnp.zeros((in_dim,), jnp.float32),
        "w1": w1, "b1": b1,
        "w2": w2, "b2": b2,
        "ln_out_gamma": jnp.ones((out_dim,), jnp.float32),
        "ln_out_beta": jnp.zeros((out_dim,), jnp.float32),
    }


def reference(x, p, cast=None):
    """Pure-JAX reference.  `cast` optionally mirrors the kernel's streaming
    dtype (values rounded to `cast` at the same points the kernel rounds)."""
    if cast is None:
        c = lambda a: a
    else:
        c = lambda a: a.astype(cast).astype(jnp.float32)

    def ln(v, g, b):
        m = jnp.mean(v, axis=-1, keepdims=True)
        vc = v - m
        var = jnp.mean(vc * vc, axis=-1, keepdims=True)
        return vc * jax.lax.rsqrt(var + EPS) * g + b

    h = ln(c(x), p["ln_in_gamma"], p["ln_in_beta"])
    h = jnp.maximum(c(h) @ c(p["w1"]).T + p["b1"], 0.0)
    y = c(h) @ c(p["w2"]).T + p["b2"]
    return ln(y, p["ln_out_gamma"], p["ln_out_beta"])


if __name__ == "__main__":
    key = jax.random.PRNGKey(0)
    k_x, k_p, k_x2, k_p2 = jax.random.split(key, 4)

    # Test 1: f32 streaming path, auto tile (grid of 2 steps even for small N).
    N, in_dim, hidden_dim, out_dim = 16, 64, 32, 48
    x = jax.random.normal(k_x, (N, in_dim), jnp.float32)
    params = init_params(k_p, in_dim, hidden_dim, out_dim)
    out = jax.block_until_ready(mlp_encoder(x, params, act_dtype=jnp.float32))
    ref = reference(x, params)
    assert out.shape == (N, out_dim)
    assert jnp.max(jnp.abs(out - ref)) < 2e-4, "mismatch vs f32 reference (test 1)"

    # Test 2: bf16 streaming (default), ragged sizes + multi-step row grid
    # (exercises lane padding, ragged last row-tile, explicit tile_n).
    N2, in2, hid2, out2 = 300, 100, 72, 50
    x2 = jax.random.normal(k_x2, (N2, in2), jnp.float32)
    p2 = init_params(k_p2, in2, hid2, out2)
    out2_k = jax.block_until_ready(mlp_encoder(x2, p2, tile_n=64))
    ref2 = reference(x2, p2, cast=jnp.bfloat16)
    assert out2_k.shape == (N2, out2)
    assert jnp.max(jnp.abs(out2_k - ref2)) < 1e-2, \
        "mismatch vs bf16-matched reference (test 2)"

    print("KERNEL_OK")
</pallas_src>

<mosaic_0001>
module attributes {stable_mosaic.version = 11 : i64} {
  func.func @_mlp_encoder_kernel(%arg0: i32, %arg1: memref<8x128xf32, #tpu.memory_space<vmem>>, %arg2: memref<1x128xf32, #tpu.memory_space<vmem>>, %arg3: memref<1x128xf32, #tpu.memory_space<vmem>>, %arg4: memref<128x128xf32, #tpu.memory_space<vmem>>, %arg5: memref<1x128xf32, #tpu.memory_space<vmem>>, %arg6: memref<128x128xf32, #tpu.memory_space<vmem>>, %arg7: memref<1x128xf32, #tpu.memory_space<vmem>>, %arg8: memref<1x128xf32, #tpu.memory_space<vmem>>, %arg9: memref<1x128xf32, #tpu.memory_space<vmem>>, %arg10: memref<8x128xf32, #tpu.memory_space<vmem>>) attributes {dimension_semantics = [#tpu.dimension_semantics<parallel>], iteration_bounds = array<i64: 2>, scalar_prefetch = 0 : i64, scratch_operands = 0 : i64, tpu.core_type = #tpu.core_type<tc>, window_params = [{transform_indices = @transform_0, window_bounds = array<i64: 8, 128>}, {pipeline_mode = #tpu.pipeline_mode<synchronous>, transform_indices = @transform_1, window_bounds = array<i64: 1, 128>}, {pipeline_mode = #tpu.pipeline_mode<synchronous>, transform_indices = @transform_2, window_bounds = array<i64: 1, 128>}, {pipeline_mode = #tpu.pipeline_mode<synchronous>, transform_indices = @transform_3, window_bounds = array<i64: 128, 128>}, {pipeline_mode = #tpu.pipeline_mode<synchronous>, transform_indices = @transform_4, window_bounds = array<i64: 1, 128>}, {pipeline_mode = #tpu.pipeline_mode<synchronous>, transform_indices = @transform_5, window_bounds = array<i64: 128, 128>}, {pipeline_mode = #tpu.pipeline_mode<synchronous>, transform_indices = @transform_6, window_bounds = array<i64: 1, 128>}, {pipeline_mode = #tpu.pipeline_mode<synchronous>, transform_indices = @transform_7, window_bounds = array<i64: 1, 128>}, {pipeline_mode = #tpu.pipeline_mode<synchronous>, transform_indices = @transform_8, window_bounds = array<i64: 1, 128>}, {transform_indices = @transform_9, window_bounds = array<i64: 8, 128>}]} {
    %c0 = arith.constant 0 : index
    %c0_0 = arith.constant 0 : index
    %0 = vector.load %arg1[%c0, %c0_0] : memref<8x128xf32, #tpu.memory_space<vmem>>, vector<8x128xf32>
    %c0_1 = arith.constant 0 : index
    %c0_2 = arith.constant 0 : index
    %1 = vector.load %arg2[%c0_1, %c0_2] : memref<1x128xf32, #tpu.memory_space<vmem>>, vector<1x128xf32>
    %c0_3 = arith.constant 0 : index
    %c0_4 = arith.constant 0 : index
    %2 = vector.load %arg3[%c0_3, %c0_4] : memref<1x128xf32, #tpu.memory_space<vmem>>, vector<1x128xf32>
    %cst = arith.constant dense<0.000000e+00> : vector<8xf32>
    %3 = vector.multi_reduction <add>, %0, %cst [1] : vector<8x128xf32> to vector<8xf32>
    %4 = vector.shape_cast %3 : vector<8xf32> to vector<8x1xf32>
    %cst_5 = arith.constant 1.562500e-02 : f32
    %5 = vector.broadcast %cst_5 : f32 to vector<8x1xf32>
    %6 = arith.mulf %4, %5 : vector<8x1xf32>
    %7 = arith.mulf %0, %0 : vector<8x128xf32>
    %cst_6 = arith.constant dense<0.000000e+00> : vector<8xf32>
    %8 = vector.multi_reduction <add>, %7, %cst_6 [1] : vector<8x128xf32> to vector<8xf32>
    %9 = vector.shape_cast %8 : vector<8xf32> to vector<8x1xf32>
    %cst_7 = arith.constant 1.562500e-02 : f32
    %10 = vector.broadcast %cst_7 : f32 to vector<8x1xf32>
    %11 = arith.mulf %9, %10 : vector<8x1xf32>
    %12 = arith.mulf %6, %6 : vector<8x1xf32>
    %13 = arith.subf %11, %12 : vector<8x1xf32>
    %cst_8 = arith.constant 9.99999974E-6 : f32
    %14 = vector.broadcast %cst_8 : f32 to vector<8x1xf32>
    %15 = arith.addf %13, %14 : vector<8x1xf32>
    %16 = math.rsqrt %15 : vector<8x1xf32>
    %17 = vector.broadcast %6 : vector<8x1xf32> to vector<8x128xf32>
    %18 = arith.subf %0, %17 : vector<8x128xf32>
    %19 = vector.broadcast %16 : vector<8x1xf32> to vector<8x128xf32>
    %20 = arith.mulf %18, %19 : vector<8x128xf32>
    %21 = vector.broadcast %1 : vector<1x128xf32> to vector<8x128xf32>
    %22 = arith.mulf %20, %21 : vector<8x128xf32>
    %23 = vector.broadcast %2 : vector<1x128xf32> to vector<8x128xf32>
    %24 = arith.addf %22, %23 : vector<8x128xf32>
    %c0_9 = arith.constant 0 : index
    %c0_10 = arith.constant 0 : index
    %25 = vector.load %arg4[%c0_9, %c0_10] : memref<128x128xf32, #tpu.memory_space<vmem>>, vector<128x128xf32>
    %cst_11 = arith.constant dense<0.000000e+00> : vector<8x128xf32>
    %26 = tpu.matmul %24, %25, %cst_11 {dimension_numbers = #tpu.dot_dimension_numbers<[1], [0], [0], [1], [0, 0, 1, 1], [], []>} : vector<8x128xf32>, vector<128x128xf32>, vector<8x128xf32> -> vector<8x128xf32>
    %c0_12 = arith.constant 0 : index
    %c0_13 = arith.constant 0 : index
    %27 = vector.load %arg5[%c0_12, %c0_13] : memref<1x128xf32, #tpu.memory_space<vmem>>, vector<1x128xf32>
    %28 = vector.broadcast %27 : vector<1x128xf32> to vector<8x128xf32>
    %29 = arith.addf %26, %28 : vector<8x128xf32>
    %cst_14 = arith.constant 0.000000e+00 : f32
    %30 = vector.broadcast %cst_14 : f32 to vector<8x128xf32>
    %31 = arith.maximumf %29, %30 : vector<8x128xf32>
    %c0_15 = arith.constant 0 : index
    %c0_16 = arith.constant 0 : index
    %32 = vector.load %arg6[%c0_15, %c0_16] : memref<128x128xf32, #tpu.memory_space<vmem>>, vector<128x128xf32>
    %cst_17 = arith.constant dense<0.000000e+00> : vector<8x128xf32>
    %33 = tpu.matmul %31, %32, %cst_17 {dimension_numbers = #tpu.dot_dimension_numbers<[1], [0], [0], [1], [0, 0, 1, 1], [], []>} : vector<8x128xf32>, vector<128x128xf32>, vector<8x128xf32> -> vector<8x128xf32>
    %c0_18 = arith.constant 0 : index
    %c0_19 = arith.constant 0 : index
    %34 = vector.load %arg7[%c0_18, %c0_19] : memref<1x128xf32, #tpu.memory_space<vmem>>, vector<1x128xf32>
    %35 = vector.broadcast %34 : vector<1x128xf32> to vector<8x128xf32>
    %36 = arith.addf %33, %35 : vector<8x128xf32>
    %c0_20 = arith.constant 0 : index
    %c0_21 = arith.constant 0 : index
    %37 = vector.load %arg8[%c0_20, %c0_21] : memref<1x128xf32, #tpu.memory_space<vmem>>, vector<1x128xf32>
    %c0_22 = arith.constant 0 : index
    %c0_23 = arith.constant 0 : index
    %38 = vector.load %arg9[%c0_22, %c0_23] : memref<1x128xf32, #tpu.memory_space<vmem>>, vector<1x128xf32>
    %cst_24 = arith.constant dense<0.000000e+00> : vector<8xf32>
    %39 = vector.multi_reduction <add>, %36, %cst_24 [1] : vector<8x128xf32> to vector<8xf32>
    %40 = vector.shape_cast %39 : vector<8xf32> to vector<8x1xf32>
    %cst_25 = arith.constant 0.020833334 : f32
    %41 = vector.broadcast %cst_25 : f32 to vector<8x1xf32>
    %42 = arith.mulf %40, %41 : vector<8x1xf32>
    %43 = arith.mulf %36, %36 : vector<8x128xf32>
    %cst_26 = arith.constant dense<0.000000e+00> : vector<8xf32>
    %44 = vector.multi_reduction <add>, %43, %cst_26 [1] : vector<8x128xf32> to vector<8xf32>
    %45 = vector.shape_cast %44 : vector<8xf32> to vector<8x1xf32>
    %cst_27 = arith.constant 0.020833334 : f32
    %46 = vector.broadcast %cst_27 : f32 to vector<8x1xf32>
    %47 = arith.mulf %45, %46 : vector<8x1xf32>
    %48 = arith.mulf %42, %42 : vector<8x1xf32>
    %49 = arith.subf %47, %48 : vector<8x1xf32>
    %cst_28 = arith.constant 9.99999974E-6 : f32
    %50 = vector.broadcast %cst_28 : f32 to vector<8x1xf32>
    %51 = arith.addf %49, %50 : vector<8x1xf32>
    %52 = math.rsqrt %51 : vector<8x1xf32>
    %53 = vector.broadcast %42 : vector<8x1xf32> to vector<8x128xf32>
    %54 = arith.subf %36, %53 : vector<8x128xf32>
    %55 = vector.broadcast %52 : vector<8x1xf32> to vector<8x128xf32>
    %56 = arith.mulf %54, %55 : vector<8x128xf32>
    %57 = vector.broadcast %37 : vector<1x128xf32> to vector<8x128xf32>
    %58 = arith.mulf %56, %57 : vector<8x128xf32>
    %59 = vector.broadcast %38 : vector<1x128xf32> to vector<8x128xf32>
    %60 = arith.addf %58, %59 : vector<8x128xf32>
    %c0_29 = arith.constant 0 : index
    %c0_30 = arith.constant 0 : index
    %61 = vector.load %arg10[%c0_29, %c0_30] : memref<8x128xf32, #tpu.memory_space<vmem>>, vector<8x128xf32>
    tpu.vector_store %arg10[%c0_29, %c0_30], %60 {strides = array<i32>} : memref<8x128xf32, #tpu.memory_space<vmem>>, vector<8x128xf32>,
    return
  }
  func.func @transform_0(%arg0: i32) -> (i32, i32) {
    %c0_i32 = arith.constant 0 : i32
    %c0_i32_0 = arith.constant 0 : i32
    return %arg0, %c0_i32 : i32, i32
  }
  func.func @transform_1(%arg0: i32) -> (i32, i32) {
    %c0_i32 = arith.constant 0 : i32
    %c0_i32_0 = arith.constant 0 : i32
    %c0_i32_1 = arith.constant 0 : i32
    return %c0_i32, %c0_i32_0 : i32, i32
  }
  func.func @transform_2(%arg0: i32) -> (i32, i32) {
    %c0_i32 = arith.constant 0 : i32
    %c0_i32_0 = arith.constant 0 : i32
    %c0_i32_1 = arith.constant 0 : i32
    return %c0_i32, %c0_i32_0 : i32, i32
  }
  func.func @transform_3(%arg0: i32) -> (i32, i32) {
    %c0_i32 = arith.constant 0 : i32
    %c0_i32_0 = arith.constant 0 : i32
    %c0_i32_1 = arith.constant 0 : i32
    return %c0_i32, %c0_i32_0 : i32, i32
  }
  func.func @transform_4(%arg0: i32) -> (i32, i32) {
    %c0_i32 = arith.constant 0 : i32
    %c0_i32_0 = arith.constant 0 : i32
    %c0_i32_1 = arith.constant 0 : i32
    return %c0_i32, %c0_i32_0 : i32, i32
  }
  func.func @transform_5(%arg0: i32) -> (i32, i32) {
    %c0_i32 = arith.constant 0 : i32
    %c0_i32_0 = arith.constant 0 : i32
    %c0_i32_1 = arith.constant 0 : i32
    return %c0_i32, %c0_i32_0 : i32, i32
  }
  func.func @transform_6(%arg0: i32) -> (i32, i32) {
    %c0_i32 = arith.constant 0 : i32
    %c0_i32_0 = arith.constant 0 : i32
    %c0_i32_1 = arith.constant 0 : i32
    return %c0_i32, %c0_i32_0 : i32, i32
  }
  func.func @transform_7(%arg0: i32) -> (i32, i32) {
    %c0_i32 = arith.constant 0 : i32
    %c0_i32_0 = arith.constant 0 : i32
    %c0_i32_1 = arith.constant 0 : i32
    return %c0_i32, %c0_i32_0 : i32, i32
  }
  func.func @transform_8(%arg0: i32) -> (i32, i32) {
    %c0_i32 = arith.constant 0 : i32
    %c0_i32_0 = arith.constant 0 : i32
    %c0_i32_1 = arith.constant 0 : i32
    return %c0_i32, %c0_i32_0 : i32, i32
  }
  func.func @transform_9(%arg0: i32) -> (i32, i32) {
    %c0_i32 = arith.constant 0 : i32
    %c0_i32_0 = arith.constant 0 : i32
    return %arg0, %c0_i32 : i32, i32
  }
}

</mosaic_0001>

<bundles_post_ra>
// kernel: tpu_custom_call.1
= control target key start
LH: loop header
LB: loop body
LE: loop exit
PB: predicated region body
PF: predicated region fallthrough
CT: control target
= control target key end

     0   :  { %14 = vsyncpa [#allocation3], 0  ;;  %s1467_s0 = inlined_call_operand.hbm [shape: f32[16,128], index: 0, kind: input, shape index: {}]   ;;  %s1468_s1 = inlined_call_operand.vmem [shape: f32[1,128], index: 1, kind: input, shape index: {}]   ;;  %s1469_s2 = inlined_call_operand.vmem [shape: f32[1,128], index: 2, kind: input, shape index: {}]   ;;  %s1470_s3 = inlined_call_operand.hbm [shape: f32[128,128], index: 3, kind: input, shape index: {}]   ;;  %s1471_s4 = inlined_call_operand.vmem [shape: f32[1,128], index: 4, kind: input, shape index: {}]   ;;  %s1472_s5 = inlined_call_operand.hbm [shape: f32[128,128], index: 5, kind: input, shape index: {}]   ;;  %s1473_s6 = inlined_call_operand.vmem [shape: f32[1,128], index: 6, kind: input, shape index: {}]   ;;  %s1474_s7 = inlined_call_operand.vmem [shape: f32[1,128], index: 7, kind: input, shape index: {}]   ;;  %s1475_s8 = inlined_call_operand.vmem [shape: f32[1,128], index: 8, kind: input, shape index: {}]   ;;  %s1476_s9 = inlined_call_operand.hbm [shape: f32[16,128], index: 9, kind: output, shape index: {}]  }
   0x1   :  { %16 = vsyncpa [#allocation3 + $0x1], 0 }
   0x2   :  { %17 = vsyncpa [#allocation6], 0 }
   0x3   :  { %18 = vsyncpa [#allocation4], 0 }
   0x4   :  { %20 = vsyncpa [#allocation4 + $0x1], 0  ;;  %s1194_s30 = smov 0   ;;  %s1196_s10 = smov 0  }
   0x5   :  { %s1198_s11 = smov 0   ;;  %s1200_s12 = smov 0  }
   0x6 LB: > { %s1215_s13 = sadd.s32 4294967295, %s1133_s12   ;;  %s727_s14 = sadd.s32 4294967294, %s1133_s12   ;;  %s1133_s12 = sphi %s1200_s12, %s1499_s12   ;;  %s1129_s11 = sphi %s1198_s11, %s1498_s11   ;;  %s1125_s10 = sphi %s1196_s10, %s1497_s10   ;;  %s1121_s30 = sphi %s1194_s30, %s1496_s30  }
   0x7   : > { %p46_p0 = scmp.ne.s32.totalorder %s1125_s10, %s1121_s30  ;;  %p1477_p1 = scmp.eq.s32.totalorder %s1215_s13, 0 }
   0x8   : > { %p244_p3 = scmp.eq.s32.totalorder %s727_s14, 1  ;;  %p728_p5 = scmp.ge.s32.totalorder %s1133_s12, 1 }
   0x9   : > { %p1224_p4 = por %p1477_p1, %p46_p0  ;;  %p251_p7 = scmp.lt.s32.totalorder %s1133_s12, 3 }
   0xa   : > { %p1229_p6 = por %p244_p3, %p46_p0  ;;  %s1135_s18 = smov [#allocation5]  }
   0xb   : > { %s1481_s15 = scalar_select %p1224_p4, 1, 0 }
   0xc   : > { %s1482_s16 = scalar_select %p1229_p6, 1, 0 }
   0xd   : > { %p1234_p8 = pnand %p728_p5, %p251_p7  ;;  %s269_s19 = sshll.u32 %s1135_s18, 4  ;;  %s1238_s19 = int_to_ptr.vmem [resolvable:$true] %s269_s19 }
   0xe   : > { %1483 = sst [smem:[#allocation12_spill]] %s1482_s16  ;;  %s1136_s21 = smov [#allocation7]  }
   0xf   : > { %p913_p9 = pneg %p1234_p8  ;;  %s285_s22 = sshll.u32 %s1136_s21, 4  ;;  %s1249_s22 = int_to_ptr.vmem [resolvable:$true] %s285_s22 }
  0x10   : > { %s977_s25 = scalar_lea.hbm %s1470_s3, 2048 }
  0x11   : > { %p1245_p11 = pnand %p913_p9, %p1477_p1  ;;  %p978_p12 = scmp.ne.s32.totalorder %s1470_s3, %s977_s25 }
  0x12   : > { %p984_p5 = scmp.lt.u32.totalorder %s977_s25, %s1470_s3 }
  0x13   : > { %p979_p13 = pneg %p1245_p11 }
  0x15   : > { %p980_p0 = pnand %p979_p13, %p978_p12 }
  0x17   : > { %p981_p3 = pneg %p980_p0 }
  0x19   : > { %p986_p7 = pnand %p984_p5, %p981_p3 }
  0x1b   : > { %989 = shalt.err (!%p986_p7)
}
  0x1c   : > { %s990_s14 = scalar_lea.vmem %s1238_s19, 2048  ;;  %p998_p2 = scmp.lt.s32.totalorder %s1238_s19, %s1238_s19 }
  0x1d   : > { %p991_p9 = scmp.ne.s32.totalorder %s1238_s19, %s990_s14  ;;  %p999_p12 = scmp.lt.s32.totalorder %s990_s14, %s990_s14 }
  0x1f   : > { %p993_p10 = pnand %p991_p9, %p979_p13  ;;  %p1000_p0 = por %p999_p12, %p998_p2 }
  0x21   : > { %p994_p1 = pneg %p993_p10 }
  0x23   : > { %p1001_p6 = pnand %p1000_p0, %p994_p1 }
  0x25   : > { %1004 = shalt.err (!%p1001_p6)
}
  0x26   : > { %s1137_s18 = smov 128   ;;  %s1138_s21 = smov 8  }
  0x27   : > { %916 = dma.hbm_to_vmem [thread:$0]  (!%p1245_p11), %s1470_s3, 2048, %s1238_s19, [#allocation6], %s1137_s18, %s1137_s18, %s1138_s21  }
  0x28   : > { %s1005_s27 = scalar_lea.hbm %s1472_s5, 2048 }
  0x29   : > { %p1006_p2 = scmp.ne.s32.totalorder %s1472_s5, %s1005_s27  ;;  %p1012_p10 = scmp.lt.u32.totalorder %s1005_s27, %s1472_s5 }
  0x2b   : > { %p1008_p1 = pnand %p1006_p2, %p979_p13 }
  0x2d   : > { %p1009_p6 = pneg %p1008_p1 }
  0x2f   : > { %p1014_p3 = pnand %p1012_p10, %p1009_p6 }
  0x31   : > { %1017 = shalt.err (!%p1014_p3)
}
  0x32   : > { %s1018_s19 = scalar_lea.vmem %s1249_s22, 2048  ;;  %p1026_p12 = scmp.lt.s32.totalorder %s1249_s22, %s1249_s22 }
  0x33   : > { %p1019_p5 = scmp.ne.s32.totalorder %s1249_s22, %s1018_s19  ;;  %p1027_p0 = scmp.lt.s32.totalorder %s1018_s19, %s1018_s19 }
  0x35   : > { %p1021_p7 = pnand %p1019_p5, %p979_p13  ;;  %p1028_p2 = por %p1027_p0, %p1026_p12 }
  0x37   : > { %p1022_p9 = pneg %p1021_p7 }
  0x39   : > { %p1029_p1 = pnand %p1028_p2, %p1022_p9 }
  0x3b   : > { %1032 = shalt.err (!%p1029_p1)
}
  0x3c   : > { %919 = dma.hbm_to_vmem [thread:$0]  (!%p1245_p11), %s1472_s5, 2048, %s1249_s22, [#allocation6], %s1137_s18, %s1137_s18, %s1138_s21  }
  0x3d   : > { %s1304_s24 = sadd.s32 1, %s1133_s12   ;;  %s33_s20 = sadd.s32 1, %s1129_s11 }
  0x3e   : > { %s30_s25 = ssub.s32 %s1133_s12, %s1304_s24  ;;  %p40_p13 = scmp.ne.s32.totalorder %s1129_s11, %s1125_s10 }
  0x3f   : > { %p31_p6 = scmp.eq.s32.totalorder %s30_s25, 0  ;;  %p41_p10 = scmp.eq.s32.totalorder %s1133_s12, 0 }
  0x40   : > { %p1486_p3 = scmp.eq.s32.totalorder %s1215_s13, 1  ;;  %p930_p7 = scmp.lt.s32.totalorder %s1133_s12, 2 }
  0x41   : > { %s1320_s27 = scalar_select %p31_p6, %s1129_s11, %s33_s20  }
  0x42   : > { %p1314_p5 = por %p1486_p3, %p40_p13  ;;  %p42_p9 = por %p41_p10, %p40_p13 }
  0x43   : > { %s308_s28 = sand.u32 1, %s1129_s11   ;;  %s733_s22 = sshll.u32 %s1133_s12, 7 }
  0x44   : > { %s1487_s26 = scalar_select %p1314_p5, 1, 0 }
  0x45   : > { %s732_s29 = sshll.u32 %s308_s28, 3  ;;  %s1327_s14 = scalar_lea.hbm %s1467_s0, %s733_s22 }
  0x46   : > { %s312_s19 = scalar_lea.vmem [#allocation2], %s732_s29  ;;  %p1331_p11 = pnand %p930_p7, %p42_p9 }
  0x47   : > { %s319_s16 = sshll.u32 %s312_s19, 4  ;;  %s309_s20 = scalar_lea.sflag [#allocation3], %s308_s28  ;;  %s1329_s16 = int_to_ptr.vmem [resolvable:$true] %s319_s16 }
  0x48   : > { %s1033_s25 = scalar_lea.hbm %s1327_s14, 128  ;;  %p1035_p0 = pneg %p1331_p11 }
  0x49   : > { %p1034_p12 = scmp.ne.s32.totalorder %s1327_s14, %s1033_s25  ;;  %s1038_s18 = scalar_lea.hbm %s1467_s0, 256 }
  0x4a   : > { %p1039_p13 = scmp.lt.u32.totalorder %s1327_s14, %s1467_s0  ;;  %p1040_p6 = scmp.lt.u32.totalorder %s1038_s18, %s1033_s25 }
  0x4b   : > { %p1036_p2 = pnand %p1035_p0, %p1034_p12  ;;  %p1042_p3 = scmp.lt.u32.totalorder %s1033_s25, %s1327_s14 }
  0x4c   : > { %p1041_p10 = por %p1040_p6, %p1039_p13 }
  0x4d   : > { %p1037_p1 = pneg %p1036_p2 }
  0x4e   : > { %p1043_p7 = por %p1042_p3, %p1041_p10 }
  0x50   : > { %p1044_p9 = pnand %p1043_p7, %p1037_p1 }
  0x52   : > { %1047 = shalt.err (!%p1044_p9)
}
  0x53   : > { %s1048_s28 = scalar_lea.vmem %s1329_s16, 128  ;;  %s1139_s22 = smov [#allocation2]  }
  0x54   : > { %p1049_p12 = scmp.ne.s32.totalorder %s1329_s16, %s1048_s28  ;;  %s1053_s29 = sshll.u32 %s1139_s22, 4  ;;  %s1054_s29 = int_to_ptr.vmem [resolvable:$false] %s1053_s29 }
  0x55   : > { %s1055_s21 = scalar_lea.vmem %s1054_s29, 256  ;;  %p1056_p4 = scmp.lt.s32.totalorder %s1329_s16, %s1054_s29 }
  0x56   : > { %p1051_p2 = pnand %p1049_p12, %p1035_p0  ;;  %p1057_p13 = scmp.lt.s32.totalorder %s1055_s21, %s1048_s28 }
  0x58   : > { %p1052_p5 = pneg %p1051_p2  ;;  %p1058_p6 = por %p1057_p13, %p1056_p4 }
  0x5a   : > { %p1059_p10 = pnand %p1058_p6, %p1052_p5 }
  0x5c   : > { %1062 = shalt.err (!%p1059_p10)
}
  0x5d   : > { %923 = dma.hbm_to_vmem [thread:$0]  (!%p1331_p11), %s1327_s14, 128, %s1329_s16, %s309_s20  }
  0x5e   : > { %328 = sbr.rel (%p1234_p8) target bundleno = 889 (0x379), region = 56  ;;  %s1363_s25 = sand.u32 (!%p1234_p8), 1, %s1125_s10  }
  0x5f   : > { %s735_s18 = sshll.u32 (!%p1234_p8), %s1363_s25, 3  ;;  %s331_s19 = scalar_lea.sflag (!%p1234_p8), [#allocation3], %s1363_s25 }
  0x60   : > { %s334_s28 = scalar_lea.vmem (!%p1234_p8), [#allocation2], %s735_s18  ;;  %p1489_p4 = scmp.ne.s32.totalorder (!%p1234_p8), %s1481_s15, 0 }
  0x65   : > { %1108 = dma.done.wait (%p1489_p4), %s331_s19, 128  }
  0x66   : > { %1110 = vsyncadd (%p1489_p4), %s331_s19, 4294967168  ;;  %p1490_p5 = scmp.eq.s32.totalorder %s1215_s13, 0 }
  0x68   : > { %1112 = dma.done.wait (%p1490_p5), [#allocation6], 4096   ;;  %p1491_p8 = pmov %p1490_p5 }
  0x69   : > { %v1140_v0 = vmov 0.0|0.0   ;;  %v1379_v1 = vld [vmem:[%s334_s28] sm:$0xff]  ;;  %v407_v2 = vld [vmem:[#allocation5] sm:$0xff]  ;;  %v408_v3 = vld [vmem:[#allocation5 + $0x8] sm:$0xff]  ;;  %vm1141_vm0 = vmmov 0   ;;  %v1142_v20 = vmov 0.0  }
  0x6a   : > { %1114 = vsyncadd (%p1491_p8), [#allocation6], 4294963200  ;;  %853 = vmatprep.subr.bf16.mxu0 %v1140_v0  ;;  %877 = vmatprep.subr.bf16.mxu1 %v1140_v0  ;;  %v383_v4 = vmul.f32 %v1379_v1, %v1379_v1  ;;  %v854_v5 = vpack.c.bf16 %v408_v3, %v407_v2  ;;  %v409_v6 = vld [vmem:[#allocation5 + $0x10] sm:$0xff]  ;;  %v410_v7 = vld [vmem:[#allocation5 + $0x18] sm:$0xff]  ;;  %s746_s17 = sshll.u32 %s1215_s13, 7  ;;  %s376_s14 = scalar_lea.vmem [#allocation8], %s735_s18 }
  0x6b   : > { %380 = vadd.xlane.f32.xlu0 %v1379_v1  ;;  %v857_v8 = vpack.c.bf16 %v410_v7, %v409_v6  ;;  %v411_v9 = vld [vmem:[#allocation5 + $0x20] sm:$0xff]  ;;  %v412_v10 = vld [vmem:[#allocation5 + $0x28] sm:$0xff]  ;;  %v413_v12 = vld [vmem:[#allocation5 + $0x30] sm:$0xff]  ;;  %815 = vmatprep.mubr.msk.f32.mxu0 %vm1141_vm0, %v1142_v20  ;;  %s638_s16 = sshll.u32 %s376_s14, 4  ;;  %s1423_s22 = scalar_lea.hbm %s1476_s9, %s746_s17  ;;  %s1425_s16 = int_to_ptr.vmem [resolvable:$true] %s638_s16 }
  0x6c   : > { %855 = vmatpush3.bf16.msra.mxu0 %v854_v5  ;;  %v860_v11 = vpack.c.bf16 %v412_v10, %v411_v9  ;;  %v414_v13 = vld [vmem:[#allocation5 + $0x38] sm:$0xff]  ;;  %v415_v15 = vld [vmem:[#allocation5 + $0x40] sm:$0xff]  ;;  %v416_v16 = vld [vmem:[#allocation5 + $0x48] sm:$0xff]  ;;  %850 = vmatprep.mubr.msk.f32.mxu1 %vm1141_vm0, %v1142_v20  ;;  %s625_s29 = scalar_lea.sflag [#allocation4], %s1363_s25  ;;  %s1063_s21 = scalar_lea.vmem %s1425_s16, 128 }
  0x6d   : > { %856 = vmatprep.subr.bf16.mxu0 %v1140_v0  ;;  %v863_v14 = vpack.c.bf16 %v414_v13, %v413_v12  ;;  %v866_v17 = vpack.c.bf16 %v416_v16, %v415_v15  ;;  %v417_v18 = vld [vmem:[#allocation5 + $0x50] sm:$0xff]  ;;  %v418_v19 = vld [vmem:[#allocation5 + $0x58] sm:$0xff]  ;;  %v419_v22 = vld [vmem:[#allocation5 + $0x60] sm:$0xff]  ;;  %p1064_p11 = scmp.ne.s32.totalorder %s1425_s16, %s1063_s21  ;;  %p1492_p0 = scmp.ne.s32.totalorder %s1487_s26, 0 }
  0x6e   : > { %v869_v21 = vpack.c.bf16 %v418_v19, %v417_v18  ;;  %v420_v23 = vld [vmem:[#allocation5 + $0x68] sm:$0xff]  ;;  %v421_v25 = vld [vmem:[#allocation5 + $0x70] sm:$0xff]  ;;  %v422_v26 = vld [vmem:[#allocation5 + $0x78] sm:$0xff]  ;;  %s1143_s13 = smov [#allocation8]  }
  0x6f   : > { %384 = vadd.xlane.f32.xlu0 %v383_v4  ;;  %v872_v24 = vpack.c.bf16 %v420_v23, %v419_v22  ;;  %v875_v27 = vpack.c.bf16 %v422_v26, %v421_v25  ;;  %v501_v28 = vld [vmem:[#allocation7] sm:$0xff]  ;;  %v502_v29 = vld [vmem:[#allocation7 + $0x8] sm:$0xff]  ;;  %v503_v30 = vld [vmem:[#allocation7 + $0x10] sm:$0xff]  ;;  %p1065_p1 = pnand %p1064_p11, %p1492_p0  ;;  %s1067_s18 = sshll.u32 %s1143_s13, 4  ;;  %s1068_s18 = int_to_ptr.vmem [resolvable:$false] %s1067_s18 }
  0x70   : > { %858 = vmatpush3.bf16.msra.mxu0 %v857_v8  ;;  %v878_v31 = vpack.c.bf16 %v502_v29, %v501_v28  ;;  %v504_v32 = vld [vmem:[#allocation7 + $0x18] sm:$0xff]  ;;  %v505_v34 = vld [vmem:[#allocation7 + $0x20] sm:$0xff]  ;;  %v506_v35 = vld [vmem:[#allocation7 + $0x28] sm:$0xff]  ;;  %s1069_s19 = scalar_lea.vmem %s1068_s18, 256  ;;  %p1070_p7 = scmp.lt.s32.totalorder %s1425_s16, %s1068_s18 }
  0x71   : > { %859 = vmatprep.subr.bf16.mxu0 %v1140_v0  ;;  %v881_v33 = vpack.c.bf16 %v504_v32, %v503_v30  ;;  %v884_v36 = vpack.c.bf16 %v506_v35, %v505_v34  ;;  %v507_v37 = vld [vmem:[#allocation7 + $0x30] sm:$0xff]  ;;  %v508_v38 = vld [vmem:[#allocation7 + $0x38] sm:$0xff]  ;;  %v509_v40 = vld [vmem:[#allocation7 + $0x40] sm:$0xff]  ;;  %p1066_p3 = pneg %p1065_p1  ;;  %p1071_p9 = scmp.lt.s32.totalorder %s1069_s19, %s1063_s21 }
  0x72   : > { %879 = vmatpush3.bf16.msra.mxu1 %v878_v31  ;;  %v887_v39 = vpack.c.bf16 %v508_v38, %v507_v37  ;;  %v510_v41 = vld [vmem:[#allocation7 + $0x48] sm:$0xff]  ;;  %v511_v43 = vld [vmem:[#allocation7 + $0x50] sm:$0xff]  ;;  %v512_v44 = vld [vmem:[#allocation7 + $0x58] sm:$0xff] }
  0x73   : > { %880 = vmatprep.subr.bf16.mxu1 %v1140_v0  ;;  %v890_v42 = vpack.c.bf16 %v510_v41, %v509_v40  ;;  %v893_v45 = vpack.c.bf16 %v512_v44, %v511_v43  ;;  %v513_v46 = vld [vmem:[#allocation7 + $0x60] sm:$0xff]  ;;  %v514_v47 = vld [vmem:[#allocation7 + $0x68] sm:$0xff]  ;;  %v739_v58 = vld [vmem:[%s1468_s1] ss:$0 sm:$0xff]  ;;  %p1072_p12 = por %p1071_p9, %p1070_p7 }
  0x74   : > { %861 = vmatpush3.bf16.msra.mxu0 %v860_v11  ;;  %v896_v48 = vpack.c.bf16 %v514_v47, %v513_v46  ;;  %v740_v60 = vld [vmem:[%s1469_s2] ss:$0 sm:$0xff] }
  0x75   : > { %862 = vmatprep.subr.bf16.mxu0 %v1140_v0  ;;  %v515_v63 = vld [vmem:[#allocation7 + $0x70] sm:$0xff]  ;;  %p1073_p2 = pnand %p1072_p12, %p1066_p3 }
  0x76   : > { %882 = vmatpush3.bf16.msra.mxu1 %v881_v33  ;;  %v742_v7 = vld [vmem:[%s1473_s6] ss:$0 sm:$0xff] }
  0x77   : > { %883 = vmatprep.subr.bf16.mxu1 %v1140_v0  ;;  %v744_v23 = vld [vmem:[%s1475_s8] ss:$0 sm:$0xff] }
  0x78   : > { %864 = vmatpush3.bf16.msra.mxu0 %v863_v14 }
  0x79   : > { %865 = vmatprep.subr.bf16.mxu0 %v1140_v0 }
  0x7a   : > { %885 = vmatpush3.bf16.msra.mxu1 %v884_v36 }
  0x7b   : > { %886 = vmatprep.subr.bf16.mxu1 %v1140_v0 }
  0x7c   : > { %867 = vmatpush3.bf16.msra.mxu0 %v866_v17 }
  0x7d   : > { %868 = vmatprep.subr.bf16.mxu0 %v1140_v0 }
  0x7e   : > { %888 = vmatpush3.bf16.msra.mxu1 %v887_v39 }
  0x7f   : > { %889 = vmatprep.subr.bf16.mxu1 %v1140_v0 }
  0x80   : > { %870 = vmatpush3.bf16.msra.mxu0 %v869_v21  ;;  %v743_v21 = vld [vmem:[%s1474_s7] ss:$0 sm:$0xff] }
  0x81   : > { %871 = vmatprep.subr.bf16.mxu0 %v1140_v0 }
  0x82   : > { %891 = vmatpush3.bf16.msra.mxu1 %v890_v42 }
  0x83   : > { %892 = vmatprep.subr.bf16.mxu1 %v1140_v0 }
  0x84   : > { %873 = vmatpush3.bf16.msra.mxu0 %v872_v24 }
  0x85   : > { %874 = vmatprep.subr.bf16.mxu0 %v1140_v0 }
  0x86   : > { %894 = vmatpush3.bf16.msra.mxu1 %v893_v45 }
  0x87   : > { %895 = vmatprep.subr.bf16.mxu1 %v1140_v0 }
  0x88   : > { %876 = vmatpush3.bf16.msra.mxu0 %v875_v27 }
  0x8a   : > { %897 = vmatpush3.bf16.msra.mxu1 %v896_v48 }
  0x8b   : > { %898 = vmatprep.subr.bf16.mxu1 %v1140_v0  ;;  %v516_v0 = vld [vmem:[#allocation7 + $0x78] sm:$0xff] }
  0x8c   : > { %v899_v2 = vpack.c.bf16 %v516_v0, %v515_v63 }
  0x8e   : > { %900 = vmatpush3.bf16.msra.mxu1 %v899_v2 }
  0xf8   : > { %v381_v49 = vpop.xlane.xlu0 %380 }
  0xf9   : > { %v382_v50 = vmul.f32 0.015625, %v381_v49 }
  0xfb   : > { %v387_v52 = vmul.f32 %v382_v50, %v382_v50  ;;  %v391_v56 = vsub.f32 %v1379_v1, %v382_v50  ;;  %v741_v1 = vld [vmem:[%s1471_s4] ss:$0 sm:$0xff] }
  0xfc   : > { %v385_v51 = vpop.xlane.xlu0 %384 }
  0xfd   : > { %v386_v53 = vmul.f32 0.015625, %v385_v51 }
  0xff   : > { %v388_v54 = vsub.f32 %v386_v53, %v387_v52 }
 0x101   : > { %v389_v55 = vadd.f32 1e-05, %v388_v54 }
 0x103   : > { %973 = vrsqrt.f32 %v389_v55 }
 0x10d   : > { %v974_v57 = vpop.eup %973 }
 0x10e   : > { %v392_v59 = vmul.f32 %v974_v57, %v391_v56 }
 0x110   : > { %v399_v61 = vmul.f32 %v739_v58, %v392_v59 }
 0x112   : > { %v406_v62 = vadd.f32 %v740_v60, %v399_v61 }
 0x114   : > { %816 = vmatmul.mubr.f32.vlgmr.msra.gmra.mrb[0].mxu0 %v406_v62 }
 0x1e7   : > { %v496_v3 = vpop.f32.mrb[0].mxu0 }
 0x1e8   : > { %v497_v4 = vadd.f32 %v741_v1, %v496_v3  ;;  %v817_v5 = vpop.f32.mrb[1].mxu0 }
 0x1ea   : > { %v500_v6 = vmax.f32 %v497_v4, 0.0 }
 0x1ec   : > { %851 = vmatmul.mubr.f32.vlgmr.msra.gmra.mrb[0].mxu1 %v500_v6 }
 0x2bf   : > { %v590_v8 = vpop.f32.mrb[0].mxu1 }
 0x2c0   : > { %v591_v9 = vadd.f32 %v742_v7, %v590_v8  ;;  %v852_v10 = vpop.f32.mrb[1].mxu1 }
 0x2c2   : > { %596 = vadd.xlane.f32.xlu1 %v591_v9  ;;  %v599_v11 = vmul.f32 %v591_v9, %v591_v9 }
 0x2c6   : > { %600 = vadd.xlane.f32.xlu1 %v599_v11 }
 0x34f   : > { %v597_v12 = vpop.xlane.xlu1 %596 }
 0x350   : > { %v598_v13 = vmul.f32 0.020833334, %v597_v12 }
 0x352   : > { %v603_v15 = vmul.f32 %v598_v13, %v598_v13  ;;  %v607_v19 = vsub.f32 %v591_v9, %v598_v13 }
 0x353   : > { %v601_v14 = vpop.xlane.xlu1 %600 }
 0x354   : > { %v602_v16 = vmul.f32 0.020833334, %v601_v14 }
 0x356   : > { %v604_v17 = vsub.f32 %v602_v16, %v603_v15 }
 0x358   : > { %v605_v18 = vadd.f32 1e-05, %v604_v17 }
 0x35a   : > { %975 = vrsqrt.f32 %v605_v18 }
 0x364   : > { %v976_v20 = vpop.eup %975 }
 0x365   : > { %v608_v22 = vmul.f32 %v976_v20, %v607_v19 }
 0x367   : > { %v615_v24 = vmul.f32 %v743_v21, %v608_v22 }
 0x369   : > { %v622_v25 = vadd.f32 %v744_v23, %v615_v24 }
 0x36b   : > { %623 = vst [vmem:[%s376_s14] sm:$0xff] %v622_v25 }
 0x36c   : > { %1076 = shalt.err (!%p1073_p2)
}
 0x36d   : > { %s1077_s25 = scalar_lea.hbm %s1423_s22, 128  ;;  %s1081_s17 = scalar_lea.hbm %s1476_s9, 256 }
 0x36e   : > { %p1078_p13 = scmp.ne.s32.totalorder %s1423_s22, %s1077_s25  ;;  %p1082_p4 = scmp.lt.u32.totalorder %s1423_s22, %s1476_s9 }
 0x36f   : > { %p1083_p5 = scmp.lt.u32.totalorder %s1081_s17, %s1077_s25  ;;  %p1085_p11 = scmp.lt.u32.totalorder %s1077_s25, %s1423_s22 }
 0x370   : > { %p1079_p6 = pnand %p1078_p13, %p1492_p0 }
 0x371   : > { %p1084_p8 = por %p1083_p5, %p1082_p4 }
 0x372   : > { %p1080_p10 = pneg %p1079_p6 }
 0x373   : > { %p1086_p1 = por %p1085_p11, %p1084_p8 }
 0x375   : > { %p1087_p3 = pnand %p1086_p1, %p1080_p10 }
 0x377   : > { %1090 = shalt.err (!%p1087_p3)
}
 0x378   : > { %911 = dma.vmem_to_hbm [thread:$0]  (%p1492_p0), %s1425_s16, 128, %s1423_s22, %s625_s29  }
 0x379 PF: > { %s1493_s20 = sld [smem:[#allocation12_spill]]  ;;  %s650_s21 = sand.u32 1, %s1121_s30  }
 0x37a   : > { %p1495_p9 = scmp.ge.s32.totalorder %s1133_s12, 2  ;;  %s651_s13 = scalar_lea.sflag [#allocation4], %s650_s21 }
 0x37f   : > { %p1494_p7 = scmp.ne.s32.totalorder %s1493_s20, 0 }
 0x381   : > { %p925_p12 = pnand %p1495_p9, %p1494_p7 }
 0x383   : > { %1116 = dma.done.wait (!%p925_p12), %s651_s13, 128  }
 0x384   : > { %1118 = vsyncadd (!%p925_p12), %s651_s13, 4294967168  ;;  %p23_p2 = scmp.ge.s32.totalorder %s1304_s24, 4   ;;  %s1496_s30 = smov %s1125_s10 }
 0x385   : > { %s1497_s10 = smov %s1129_s11  ;;  %s1498_s11 = smov %s1320_s27 }
 0x386   : > { %s1499_s12 = smov %s1304_s24  ;;  %25 = sbr.rel (!%p23_p2) target bundleno = 6 (0x6), region = 109 }
 0x38d   :  { %656 = vsyncpa [#allocation3], 1 }
 0x38e   :  { %658 = vsyncpa [#allocation3 + $0x1], 1 }
 0x38f   :  { %659 = vsyncpa [#allocation6], 1 }
 0x390   :  { %660 = vsyncpa [#allocation4], 1 }
 0x391   :  { %662 = vsyncpa [#allocation4 + $0x1], 1 }

</bundles_post_ra>
